<compile_context>
chip_gen: v6e
topology: v6e:2x2x1
jax: 0.10.0
libtpu: 0.0.40
codegen_flags: <defaults>
</compile_context>

<pallas_src>
import jax
import jax.numpy as jnp
from jax.experimental import pallas as pl
from jax.experimental.pallas import tpu as pltpu

# --- problem constants (from the gym env the module references) ---
STATE_DIM = 24
ACTION_DIM = 4
TIMES = 2

IN_STATE = STATE_DIM * TIMES           # 48
IN_CAT = ACTION_DIM + IN_STATE         # 52
H1 = STATE_DIM * 32                    # 768
H2 = ACTION_DIM * 48                   # 192
OUT = 1
LN_EPS = 1e-5


def _round_up(x, m):
    return ((x + m - 1) // m) * m


def critic_kernel(x_ref,
                  w1_ref, b1_ref, g1_ref, be1_ref,
                  w2_ref, b2_ref, g2_ref, be2_ref,
                  w3_ref, b3_ref,
                  o_ref):
    x = x_ref[...]                                      # (TB, 52) = [state | action]

    # ---- lin1: single fused MXU matmul (concat done in wrapper) ----
    h1 = jnp.dot(x, w1_ref[...], preferred_element_type=jnp.float32) + b1_ref[...]

    # ---- LayerNorm(768) + ReLU, one-pass statistics ----
    mu1 = jnp.mean(h1, axis=-1, keepdims=True)
    ex1 = jnp.mean(h1 * h1, axis=-1, keepdims=True)
    var1 = ex1 - mu1 * mu1
    h1 = (h1 - mu1) * jax.lax.rsqrt(var1 + LN_EPS) * g1_ref[...] + be1_ref[...]
    h1 = jnp.maximum(h1, 0.0)

    # ---- lin2 + LayerNorm(192) + ReLU ----
    h2 = jnp.dot(h1, w2_ref[...], preferred_element_type=jnp.float32) + b2_ref[...]
    mu2 = jnp.mean(h2, axis=-1, keepdims=True)
    ex2 = jnp.mean(h2 * h2, axis=-1, keepdims=True)
    var2 = ex2 - mu2 * mu2
    h2 = (h2 - mu2) * jax.lax.rsqrt(var2 + LN_EPS) * g2_ref[...] + be2_ref[...]
    h2 = jnp.maximum(h2, 0.0)

    # ---- lin3: (192 -> 1) as VPU multiply + cross-lane reduce (no MXU matvec) ----
    o_ref[...] = (jnp.sum(h2 * w3_ref[...], axis=-1, keepdims=True)
                  + b3_ref[...])                        # (TB, 1)


def critic_forward(state, action, params, *, tile_batch=256):
    """state: (B, 48), action: (B, ...) reshaped to (B, 4). Returns (B, 1) f32."""
    B = state.shape[0]
    action = action.reshape((B, ACTION_DIM))
    x = jnp.concatenate([state, action], axis=1).astype(jnp.float32)   # (B, 52)

    (w1, b1, g1, be1, w2, b2, g2, be2, w3, b3) = params

    # Batch tile: >=8 sublanes, <= tile_batch rows; pad batch so the grid divides evenly.
    TB = min(tile_batch, max(8, _round_up(B, 8)))
    B_pad = _round_up(B, TB)
    if B_pad != B:
        x = jnp.pad(x, ((0, B_pad - B), (0, 0)))
    nb = B_pad // TB

    # Full-extent, constant-index blocks for params: DMA'd once, resident across steps.
    def resident(shape):
        return pl.BlockSpec(shape, lambda i: (0, 0))

    out = pl.pallas_call(
        critic_kernel,
        out_shape=jax.ShapeDtypeStruct((B_pad, OUT), jnp.float32),
        grid=(nb,),
        in_specs=[
            pl.BlockSpec((TB, IN_CAT), lambda i: (i, 0)),     # x tile
            resident((IN_CAT, H1)),                           # w1
            resident((1, H1)), resident((1, H1)), resident((1, H1)),   # b1, g1, be1
            resident((H1, H2)),                               # w2
            resident((1, H2)), resident((1, H2)), resident((1, H2)),   # b2, g2, be2
            resident((1, H2)),                                # w3 (as row vector)
            resident((1, OUT)),                               # b3
        ],
        out_specs=pl.BlockSpec((TB, OUT), lambda i: (i, 0)),
        compiler_params=pltpu.CompilerParams(
            dimension_semantics=("parallel",),                # megacore on v7x
        ),
        # NOTE: per-tile VMEM footprint is ~2 MiB (weights ~0.8 MiB + TB*768*4
        # activations + double-buffered I/O tiles), comfortably under the default
        # scoped VMEM limit on v5e/v6e/v7x, so no vmem_limit_bytes override.
    )(x,
      w1, b1.reshape(1, H1), g1.reshape(1, H1), be1.reshape(1, H1),
      w2, b2.reshape(1, H2), g2.reshape(1, H2), be2.reshape(1, H2),
      w3.reshape(1, H2), b3.reshape(1, OUT))

    return out[:B]

# TODO(synk): optional bf16 cast of matmul inputs (f32 accumulate) would further
# speed up lin1/lin2 on v6e/v7x but is a numerics-visible change, so it is left out.


def init_params(key):
    """Deterministic init mimicking PyTorch's nn.Linear default (U[-1/sqrt(fan_in), +])."""
    ks = jax.random.split(key, 6)

    def lin(kw, kb, fan_in, fan_out):
        bound = 1.0 / jnp.sqrt(fan_in)
        w = jax.random.uniform(kw, (fan_in, fan_out), jnp.float32, -bound, bound)
        b = jax.random.uniform(kb, (fan_out,), jnp.float32, -bound, bound)
        return w, b

    w1, b1 = lin(ks[0], ks[1], IN_CAT, H1)
    w2, b2 = lin(ks[2], ks[3], H1, H2)
    w3, b3 = lin(ks[4], ks[5], H2, OUT)
    # LayerNorm: gamma=1, beta=0 (PyTorch default)
    g1, be1 = jnp.ones((H1,), jnp.float32), jnp.zeros((H1,), jnp.float32)
    g2, be2 = jnp.ones((H2,), jnp.float32), jnp.zeros((H2,), jnp.float32)
    return (w1, b1, g1, be1, w2, b2, g2, be2, w3, b3)


def critic_reference(state, action, params):
    """Pure-JAX reference (two-pass LayerNorm, explicit concat) for correctness checking."""
    (w1, b1, g1, be1, w2, b2, g2, be2, w3, b3) = params
    x = jnp.concatenate([state, action.reshape(state.shape[0], ACTION_DIM)], axis=1)

    def ln(h, g, be):
        mu = jnp.mean(h, axis=-1, keepdims=True)
        var = jnp.mean((h - mu) ** 2, axis=-1, keepdims=True)
        return (h - mu) * jax.lax.rsqrt(var + LN_EPS) * g + be

    h = jax.nn.relu(ln(x @ w1 + b1, g1, be1))
    h = jax.nn.relu(ln(h @ w2 + b2, g2, be2))
    return h @ w3 + b3


if __name__ == "__main__":
    key = jax.random.PRNGKey(0)
    kp, ks, ka = jax.random.split(key, 3)

    B = 2
    params = init_params(kp)
    state = jax.random.normal(ks, (B, IN_STATE), jnp.float32)     # (2, 48)
    action = jax.random.normal(ka, (B, ACTION_DIM), jnp.float32)  # (2, 4)

    out = critic_forward(state, action, params)
    out = jax.block_until_ready(out)

    ref = critic_reference(state, action, params)
    assert out.shape == (B, 1), out.shape
    assert jnp.allclose(out, ref, atol=1e-4, rtol=1e-4), (out, ref)

    # Also exercise a multi-tile batch to validate the grid / padding path.
    B2 = 300
    ks2, ka2 = jax.random.split(jax.random.PRNGKey(1), 2)
    state2 = jax.random.normal(ks2, (B2, IN_STATE), jnp.float32)
    action2 = jax.random.normal(ka2, (B2, ACTION_DIM), jnp.float32)
    out2 = jax.block_until_ready(critic_forward(state2, action2, params))
    ref2 = critic_reference(state2, action2, params)
    assert out2.shape == (B2, 1), out2.shape
    assert jnp.allclose(out2, ref2, atol=1e-4, rtol=1e-4)

    print("KERNEL_OK")
</pallas_src>

<mosaic_0001>
module attributes {stable_mosaic.version = 11 : i64} {
  func.func @critic_kernel(%arg0: i32, %arg1: memref<8x52xf32, #tpu.memory_space<vmem>>, %arg2: memref<52x768xf32, #tpu.memory_space<vmem>>, %arg3: memref<1x768xf32, #tpu.memory_space<vmem>>, %arg4: memref<1x768xf32, #tpu.memory_space<vmem>>, %arg5: memref<1x768xf32, #tpu.memory_space<vmem>>, %arg6: memref<768x192xf32, #tpu.memory_space<vmem>>, %arg7: memref<1x192xf32, #tpu.memory_space<vmem>>, %arg8: memref<1x192xf32, #tpu.memory_space<vmem>>, %arg9: memref<1x192xf32, #tpu.memory_space<vmem>>, %arg10: memref<1x192xf32, #tpu.memory_space<vmem>>, %arg11: memref<1x1xf32, #tpu.memory_space<vmem>>, %arg12: memref<8x1xf32, #tpu.memory_space<vmem>>) attributes {dimension_semantics = [#tpu.dimension_semantics<parallel>], iteration_bounds = array<i64: 1>, scalar_prefetch = 0 : i64, scratch_operands = 0 : i64, tpu.core_type = #tpu.core_type<tc>, window_params = [{transform_indices = @transform_0, window_bounds = array<i64: 8, 52>}, {pipeline_mode = #tpu.pipeline_mode<synchronous>, transform_indices = @transform_1, window_bounds = array<i64: 52, 768>}, {pipeline_mode = #tpu.pipeline_mode<synchronous>, transform_indices = @transform_2, window_bounds = array<i64: 1, 768>}, {pipeline_mode = #tpu.pipeline_mode<synchronous>, transform_indices = @transform_3, window_bounds = array<i64: 1, 768>}, {pipeline_mode = #tpu.pipeline_mode<synchronous>, transform_indices = @transform_4, window_bounds = array<i64: 1, 768>}, {pipeline_mode = #tpu.pipeline_mode<synchronous>, transform_indices = @transform_5, window_bounds = array<i64: 768, 192>}, {pipeline_mode = #tpu.pipeline_mode<synchronous>, transform_indices = @transform_6, window_bounds = array<i64: 1, 192>}, {pipeline_mode = #tpu.pipeline_mode<synchronous>, transform_indices = @transform_7, window_bounds = array<i64: 1, 192>}, {pipeline_mode = #tpu.pipeline_mode<synchronous>, transform_indices = @transform_8, window_bounds = array<i64: 1, 192>}, {pipeline_mode = #tpu.pipeline_mode<synchronous>, transform_indices = @transform_9, window_bounds = array<i64: 1, 192>}, {pipeline_mode = #tpu.pipeline_mode<synchronous>, transform_indices = @transform_10, window_bounds = array<i64: 1, 1>}, {transform_indices = @transform_11, window_bounds = array<i64: 8, 1>}]} {
    %c0 = arith.constant 0 : index
    %c0_0 = arith.constant 0 : index
    %0 = vector.load %arg1[%c0, %c0_0] : memref<8x52xf32, #tpu.memory_space<vmem>>, vector<8x52xf32>
    %c0_1 = arith.constant 0 : index
    %c0_2 = arith.constant 0 : index
    %1 = vector.load %arg2[%c0_1, %c0_2] : memref<52x768xf32, #tpu.memory_space<vmem>>, vector<52x768xf32>
    %cst = arith.constant dense<0.000000e+00> : vector<8x768xf32>
    %2 = tpu.matmul %0, %1, %cst {dimension_numbers = #tpu.dot_dimension_numbers<[1], [0], [0], [1], [0, 0, 1, 1], [], []>} : vector<8x52xf32>, vector<52x768xf32>, vector<8x768xf32> -> vector<8x768xf32>
    %c0_3 = arith.constant 0 : index
    %c0_4 = arith.constant 0 : index
    %3 = vector.load %arg3[%c0_3, %c0_4] : memref<1x768xf32, #tpu.memory_space<vmem>>, vector<1x768xf32>
    %4 = vector.broadcast %3 : vector<1x768xf32> to vector<8x768xf32>
    %5 = arith.addf %2, %4 : vector<8x768xf32>
    %cst_5 = arith.constant dense<0.000000e+00> : vector<8xf32>
    %6 = vector.multi_reduction <add>, %5, %cst_5 [1] : vector<8x768xf32> to vector<8xf32>
    %7 = vector.shape_cast %6 : vector<8xf32> to vector<8x1xf32>
    %cst_6 = arith.constant 7.680000e+02 : f32
    %8 = vector.broadcast %cst_6 : f32 to vector<8x1xf32>
    %9 = arith.divf %7, %8 : vector<8x1xf32>
    %10 = arith.mulf %5, %5 : vector<8x768xf32>
    %cst_7 = arith.constant dense<0.000000e+00> : vector<8xf32>
    %11 = vector.multi_reduction <add>, %10, %cst_7 [1] : vector<8x768xf32> to vector<8xf32>
    %12 = vector.shape_cast %11 : vector<8xf32> to vector<8x1xf32>
    %cst_8 = arith.constant 7.680000e+02 : f32
    %13 = vector.broadcast %cst_8 : f32 to vector<8x1xf32>
    %14 = arith.divf %12, %13 : vector<8x1xf32>
    %15 = arith.mulf %9, %9 : vector<8x1xf32>
    %16 = arith.subf %14, %15 : vector<8x1xf32>
    %17 = vector.broadcast %9 : vector<8x1xf32> to vector<8x768xf32>
    %18 = arith.subf %5, %17 : vector<8x768xf32>
    %cst_9 = arith.constant 9.99999974E-6 : f32
    %19 = vector.broadcast %cst_9 : f32 to vector<8x1xf32>
    %20 = arith.addf %16, %19 : vector<8x1xf32>
    %21 = math.rsqrt %20 : vector<8x1xf32>
    %22 = vector.broadcast %21 : vector<8x1xf32> to vector<8x768xf32>
    %23 = arith.mulf %18, %22 : vector<8x768xf32>
    %c0_10 = arith.constant 0 : index
    %c0_11 = arith.constant 0 : index
    %24 = vector.load %arg4[%c0_10, %c0_11] : memref<1x768xf32, #tpu.memory_space<vmem>>, vector<1x768xf32>
    %25 = vector.broadcast %24 : vector<1x768xf32> to vector<8x768xf32>
    %26 = arith.mulf %23, %25 : vector<8x768xf32>
    %c0_12 = arith.constant 0 : index
    %c0_13 = arith.constant 0 : index
    %27 = vector.load %arg5[%c0_12, %c0_13] : memref<1x768xf32, #tpu.memory_space<vmem>>, vector<1x768xf32>
    %28 = vector.broadcast %27 : vector<1x768xf32> to vector<8x768xf32>
    %29 = arith.addf %26, %28 : vector<8x768xf32>
    %cst_14 = arith.constant 0.000000e+00 : f32
    %30 = vector.broadcast %cst_14 : f32 to vector<8x768xf32>
    %31 = arith.maximumf %29, %30 : vector<8x768xf32>
    %c0_15 = arith.constant 0 : index
    %c0_16 = arith.constant 0 : index
    %32 = vector.load %arg6[%c0_15, %c0_16] : memref<768x192xf32, #tpu.memory_space<vmem>>, vector<768x192xf32>
    %cst_17 = arith.constant dense<0.000000e+00> : vector<8x192xf32>
    %33 = tpu.matmul %31, %32, %cst_17 {dimension_numbers = #tpu.dot_dimension_numbers<[1], [0], [0], [1], [0, 0, 1, 1], [], []>} : vector<8x768xf32>, vector<768x192xf32>, vector<8x192xf32> -> vector<8x192xf32>
    %c0_18 = arith.constant 0 : index
    %c0_19 = arith.constant 0 : index
    %34 = vector.load %arg7[%c0_18, %c0_19] : memref<1x192xf32, #tpu.memory_space<vmem>>, vector<1x192xf32>
    %35 = vector.broadcast %34 : vector<1x192xf32> to vector<8x192xf32>
    %36 = arith.addf %33, %35 : vector<8x192xf32>
    %cst_20 = arith.constant dense<0.000000e+00> : vector<8xf32>
    %37 = vector.multi_reduction <add>, %36, %cst_20 [1] : vector<8x192xf32> to vector<8xf32>
    %38 = vector.shape_cast %37 : vector<8xf32> to vector<8x1xf32>
    %cst_21 = arith.constant 1.920000e+02 : f32
    %39 = vector.broadcast %cst_21 : f32 to vector<8x1xf32>
    %40 = arith.divf %38, %39 : vector<8x1xf32>
    %41 = arith.mulf %36, %36 : vector<8x192xf32>
    %cst_22 = arith.constant dense<0.000000e+00> : vector<8xf32>
    %42 = vector.multi_reduction <add>, %41, %cst_22 [1] : vector<8x192xf32> to vector<8xf32>
    %43 = vector.shape_cast %42 : vector<8xf32> to vector<8x1xf32>
    %cst_23 = arith.constant 1.920000e+02 : f32
    %44 = vector.broadcast %cst_23 : f32 to vector<8x1xf32>
    %45 = arith.divf %43, %44 : vector<8x1xf32>
    %46 = arith.mulf %40, %40 : vector<8x1xf32>
    %47 = arith.subf %45, %46 : vector<8x1xf32>
    %48 = vector.broadcast %40 : vector<8x1xf32> to vector<8x192xf32>
    %49 = arith.subf %36, %48 : vector<8x192xf32>
    %cst_24 = arith.constant 9.99999974E-6 : f32
    %50 = vector.broadcast %cst_24 : f32 to vector<8x1xf32>
    %51 = arith.addf %47, %50 : vector<8x1xf32>
    %52 = math.rsqrt %51 : vector<8x1xf32>
    %53 = vector.broadcast %52 : vector<8x1xf32> to vector<8x192xf32>
    %54 = arith.mulf %49, %53 : vector<8x192xf32>
    %c0_25 = arith.constant 0 : index
    %c0_26 = arith.constant 0 : index
    %55 = vector.load %arg8[%c0_25, %c0_26] : memref<1x192xf32, #tpu.memory_space<vmem>>, vector<1x192xf32>
    %56 = vector.broadcast %55 : vector<1x192xf32> to vector<8x192xf32>
    %57 = arith.mulf %54, %56 : vector<8x192xf32>
    %c0_27 = arith.constant 0 : index
    %c0_28 = arith.constant 0 : index
    %58 = vector.load %arg9[%c0_27, %c0_28] : memref<1x192xf32, #tpu.memory_space<vmem>>, vector<1x192xf32>
    %59 = vector.broadcast %58 : vector<1x192xf32> to vector<8x192xf32>
    %60 = arith.addf %57, %59 : vector<8x192xf32>
    %cst_29 = arith.constant 0.000000e+00 : f32
    %61 = vector.broadcast %cst_29 : f32 to vector<8x192xf32>
    %62 = arith.maximumf %60, %61 : vector<8x192xf32>
    %c0_30 = arith.constant 0 : index
    %c0_31 = arith.constant 0 : index
    %63 = vector.load %arg10[%c0_30, %c0_31] : memref<1x192xf32, #tpu.memory_space<vmem>>, vector<1x192xf32>
    %64 = vector.broadcast %63 : vector<1x192xf32> to vector<8x192xf32>
    %65 = arith.mulf %62, %64 : vector<8x192xf32>
    %cst_32 = arith.constant dense<0.000000e+00> : vector<8xf32>
    %66 = vector.multi_reduction <add>, %65, %cst_32 [1] : vector<8x192xf32> to vector<8xf32>
    %67 = vector.shape_cast %66 : vector<8xf32> to vector<8x1xf32>
    %c0_33 = arith.constant 0 : index
    %c0_34 = arith.constant 0 : index
    %68 = vector.load %arg11[%c0_33, %c0_34] : memref<1x1xf32, #tpu.memory_space<vmem>>, vector<1x1xf32>
    %69 = vector.broadcast %68 : vector<1x1xf32> to vector<8x1xf32>
    %70 = arith.addf %67, %69 : vector<8x1xf32>
    %c0_35 = arith.constant 0 : index
    %c0_36 = arith.constant 0 : index
    %71 = vector.load %arg12[%c0_35, %c0_36] : memref<8x1xf32, #tpu.memory_space<vmem>>, vector<8x1xf32>
    tpu.vector_store %arg12[%c0_35, %c0_36], %70 {strides = array<i32>} : memref<8x1xf32, #tpu.memory_space<vmem>>, vector<8x1xf32>,
    return
  }
  func.func @transform_0(%arg0: i32) -> (i32, i32) {
    %c0_i32 = arith.constant 0 : i32
    %c0_i32_0 = arith.constant 0 : i32
    return %arg0, %c0_i32 : i32, i32
  }
  func.func @transform_1(%arg0: i32) -> (i32, i32) {
    %c0_i32 = arith.constant 0 : i32
    %c0_i32_0 = arith.constant 0 : i32
    %c0_i32_1 = arith.constant 0 : i32
    return %c0_i32, %c0_i32_0 : i32, i32
  }
  func.func @transform_2(%arg0: i32) -> (i32, i32) {
    %c0_i32 = arith.constant 0 : i32
    %c0_i32_0 = arith.constant 0 : i32
    %c0_i32_1 = arith.constant 0 : i32
    return %c0_i32, %c0_i32_0 : i32, i32
  }
  func.func @transform_3(%arg0: i32) -> (i32, i32) {
    %c0_i32 = arith.constant 0 : i32
    %c0_i32_0 = arith.constant 0 : i32
    %c0_i32_1 = arith.constant 0 : i32
    return %c0_i32, %c0_i32_0 : i32, i32
  }
  func.func @transform_4(%arg0: i32) -> (i32, i32) {
    %c0_i32 = arith.constant 0 : i32
    %c0_i32_0 = arith.constant 0 : i32
    %c0_i32_1 = arith.constant 0 : i32
    return %c0_i32, %c0_i32_0 : i32, i32
  }
  func.func @transform_5(%arg0: i32) -> (i32, i32) {
    %c0_i32 = arith.constant 0 : i32
    %c0_i32_0 = arith.constant 0 : i32
    %c0_i32_1 = arith.constant 0 : i32
    return %c0_i32, %c0_i32_0 : i32, i32
  }
  func.func @transform_6(%arg0: i32) -> (i32, i32) {
    %c0_i32 = arith.constant 0 : i32
    %c0_i32_0 = arith.constant 0 : i32
    %c0_i32_1 = arith.constant 0 : i32
    return %c0_i32, %c0_i32_0 : i32, i32
  }
  func.func @transform_7(%arg0: i32) -> (i32, i32) {
    %c0_i32 = arith.constant 0 : i32
    %c0_i32_0 = arith.constant 0 : i32
    %c0_i32_1 = arith.constant 0 : i32
    return %c0_i32, %c0_i32_0 : i32, i32
  }
  func.func @transform_8(%arg0: i32) -> (i32, i32) {
    %c0_i32 = arith.constant 0 : i32
    %c0_i32_0 = arith.constant 0 : i32
    %c0_i32_1 = arith.constant 0 : i32
    return %c0_i32, %c0_i32_0 : i32, i32
  }
  func.func @transform_9(%arg0: i32) -> (i32, i32) {
    %c0_i32 = arith.constant 0 : i32
    %c0_i32_0 = arith.constant 0 : i32
    %c0_i32_1 = arith.constant 0 : i32
    return %c0_i32, %c0_i32_0 : i32, i32
  }
  func.func @transform_10(%arg0: i32) -> (i32, i32) {
    %c0_i32 = arith.constant 0 : i32
    %c0_i32_0 = arith.constant 0 : i32
    %c0_i32_1 = arith.constant 0 : i32
    return %c0_i32, %c0_i32_0 : i32, i32
  }
  func.func @transform_11(%arg0: i32) -> (i32, i32) {
    %c0_i32 = arith.constant 0 : i32
    %c0_i32_0 = arith.constant 0 : i32
    return %arg0, %c0_i32 : i32, i32
  }
}

</mosaic_0001>

<bundles_post_ra>
// kernel: tpu_custom_call.1
= control target key start
LH: loop header
LB: loop body
LE: loop exit
PB: predicated region body
PF: predicated region fallthrough
CT: control target
= control target key end

     0   :  { %vm119_vm0 = vcmask 1043456   ;;  %v988_v3 = vmov 0.0   ;;  %vm115_vm1 = vcmask 424960   ;;  %vm889_vm2 = vcmask 523264   ;;  %s1878_s1 = inlined_call_operand.vmem [shape: f32[52,768], index: 1, kind: input, shape index: {}]   ;;  %s1879_s0 = inlined_call_operand.vmem [shape: f32[8,52], index: 0, kind: input, shape index: {}]   ;;  %s1880_s5 = inlined_call_operand.vmem [shape: f32[768,192], index: 5, kind: input, shape index: {}]   ;;  %s1881_s2 = inlined_call_operand.vmem [shape: f32[1,768], index: 2, kind: input, shape index: {}]   ;;  %s1882_s3 = inlined_call_operand.vmem [shape: f32[1,768], index: 3, kind: input, shape index: {}]   ;;  %s1883_s4 = inlined_call_operand.vmem [shape: f32[1,768], index: 4, kind: input, shape index: {}]   ;;  %s1884_s6 = inlined_call_operand.vmem [shape: f32[1,192], index: 6, kind: input, shape index: {}]   ;;  %s1885_s10 = inlined_call_operand.<no memory space> [shape: f32[1,1], index: 10, kind: input, shape index: {}]   ;;  %s1886_s7 = inlined_call_operand.vmem [shape: f32[1,192], index: 7, kind: input, shape index: {}]   ;;  %s1887_s8 = inlined_call_operand.vmem [shape: f32[1,192], index: 8, kind: input, shape index: {}]   ;;  %s1888_s9 = inlined_call_operand.vmem [shape: f32[1,192], index: 9, kind: input, shape index: {}]   ;;  %s1889_s11 = inlined_call_operand.vmem [shape: f32[8,1], index: 11, kind: output, shape index: {}]  }
   0x1   :  { %v78_v0 = vld [vmem:[%s1878_s1 + $0x128] sm:$0xf]  ;;  %v77_v1 = vld [vmem:[%s1878_s1 + $0x120] sm:$0xf]  ;;  %v72_v2 = vld [vmem:[%s1878_s1 + $0xf8] sm:$0xff]  ;;  %202 = vmatprep.mubr.f32.mxu0 %v988_v3  ;;  %vm967_vm3 = vcmask 7168  }
   0x2   :  { %973 = vmatprep.subr.msk.mxu0 %vm119_vm0, %v78_v0  ;;  %v71_v4 = vld [vmem:[%s1878_s1 + $0xf0] sm:$0xff]  ;;  %v66_v5 = vld [vmem:[%s1878_s1 + $0xc8] sm:$0xff]  ;;  %v65_v6 = vld [vmem:[%s1878_s1 + $0xc0] sm:$0xff] }
   0x3   :  { %974 = vmatpush1.msk.msra.mxu0 %vm119_vm0, %v77_v1  ;;  %v60_v7 = vld [vmem:[%s1878_s1 + $0x98] sm:$0xff]  ;;  %v59_v8 = vld [vmem:[%s1878_s1 + $0x90] sm:$0xff]  ;;  %v54_v9 = vld [vmem:[%s1878_s1 + $0x68] sm:$0xff] }
   0x4   :  { %158 = vmatprep.subr.mxu0 %v72_v2  ;;  %v53_v10 = vld [vmem:[%s1878_s1 + $0x60] sm:$0xff]  ;;  %v48_v11 = vld [vmem:[%s1878_s1 + $0x38] sm:$0xff]  ;;  %v47_v12 = vld [vmem:[%s1878_s1 + $0x30] sm:$0xff] }
   0x5   :  { %159 = vmatpush1.msra.mxu0 %v71_v4  ;;  %v42_v13 = vld [vmem:[%s1878_s1 + $0x8] sm:$0xff]  ;;  %v41_v14 = vld [vmem:[%s1878_s1] sm:$0xff]  ;;  %v80_v16 = vld [vmem:[%s1878_s1 + $0x138] sm:$0xf] }
   0x6   :  { %160 = vmatprep.subr.mxu0 %v66_v5  ;;  %v1097_v15 = vld [vmem:[%s1879_s0] sm:$0xff]  ;;  %v79_v17 = vld [vmem:[%s1878_s1 + $0x130] sm:$0xf]  ;;  %v74_v18 = vld [vmem:[%s1878_s1 + $0x108] sm:$0xff] }
   0x7   :  { %161 = vmatpush1.msra.mxu0 %v65_v6  ;;  %v73_v19 = vld [vmem:[%s1878_s1 + $0x100] sm:$0xff]  ;;  %v68_v20 = vld [vmem:[%s1878_s1 + $0xd8] sm:$0xff]  ;;  %v67_v21 = vld [vmem:[%s1878_s1 + $0xd0] sm:$0xff] }
   0x8   :  { %162 = vmatprep.subr.mxu0 %v60_v7  ;;  %v62_v22 = vld [vmem:[%s1878_s1 + $0xa8] sm:$0xff]  ;;  %v61_v23 = vld [vmem:[%s1878_s1 + $0xa0] sm:$0xff]  ;;  %v56_v24 = vld [vmem:[%s1878_s1 + $0x78] sm:$0xff] }
   0x9   :  { %163 = vmatpush1.msra.mxu0 %v59_v8  ;;  %v55_v25 = vld [vmem:[%s1878_s1 + $0x70] sm:$0xff]  ;;  %v50_v26 = vld [vmem:[%s1878_s1 + $0x48] sm:$0xff]  ;;  %v49_v27 = vld [vmem:[%s1878_s1 + $0x40] sm:$0xff] }
   0xa   :  { %164 = vmatprep.subr.mxu0 %v54_v9  ;;  %v44_v28 = vld [vmem:[%s1878_s1 + $0x18] sm:$0xff]  ;;  %v43_v29 = vld [vmem:[%s1878_s1 + $0x10] sm:$0xff]  ;;  %v82_v30 = vld [vmem:[%s1878_s1 + $0x148] sm:$0xf] }
   0xb   :  { %165 = vmatpush1.msra.mxu0 %v53_v10  ;;  %v81_v31 = vld [vmem:[%s1878_s1 + $0x140] sm:$0xf]  ;;  %v76_v32 = vld [vmem:[%s1878_s1 + $0x118] sm:$0xff]  ;;  %v75_v33 = vld [vmem:[%s1878_s1 + $0x110] sm:$0xff] }
   0xc   :  { %166 = vmatprep.subr.mxu0 %v48_v11  ;;  %v70_v34 = vld [vmem:[%s1878_s1 + $0xe8] sm:$0xff]  ;;  %v69_v35 = vld [vmem:[%s1878_s1 + $0xe0] sm:$0xff]  ;;  %v64_v36 = vld [vmem:[%s1878_s1 + $0xb8] sm:$0xff] }
   0xd   :  { %167 = vmatpush1.msra.mxu0 %v47_v12  ;;  %v63_v37 = vld [vmem:[%s1878_s1 + $0xb0] sm:$0xff]  ;;  %v58_v38 = vld [vmem:[%s1878_s1 + $0x88] sm:$0xff]  ;;  %v57_v39 = vld [vmem:[%s1878_s1 + $0x80] sm:$0xff] }
   0xe   :  { %168 = vmatprep.subr.mxu0 %v42_v13  ;;  %v52_v40 = vld [vmem:[%s1878_s1 + $0x58] sm:$0xff]  ;;  %v51_v41 = vld [vmem:[%s1878_s1 + $0x50] sm:$0xff]  ;;  %v46_v42 = vld [vmem:[%s1878_s1 + $0x28] sm:$0xff] }
   0xf   :  { %169 = vmatpush1.msra.mxu0 %v41_v14  ;;  %v45_v43 = vld [vmem:[%s1878_s1 + $0x20] sm:$0xff]  ;;  %v503_v44 = vld [vmem:[%s1880_s5 + $0xf8] sm:$0xff]  ;;  %v502_v45 = vld [vmem:[%s1880_s5 + $0xf0] sm:$0xff] }
  0x10   :  { %975 = vmatmul.mubr.msk.f32.vlgmr.msra.gmra.mxu0 %vm115_vm1, %v1097_v15  ;;  %976 = vmatprep.subr.msk.mxu0 %vm119_vm0, %v80_v16  ;;  %v567_v46 = vld [vmem:[%s1880_s5 + $0x2f8] sm:$0xff]  ;;  %v501_v47 = vld [vmem:[%s1880_s5 + $0xe8] sm:$0xff]  ;;  %v566_v48 = vld [vmem:[%s1880_s5 + $0x2f0] sm:$0xff] }
  0x11   :  { %977 = vmatpush1.msk.msra.mxu0 %vm119_vm0, %v79_v17  ;;  %273 = vmatprep.mubr.f32.mxu0 %v988_v3  ;;  %v500_v49 = vld [vmem:[%s1880_s5 + $0xe0] sm:$0xff]  ;;  %v565_v50 = vld [vmem:[%s1880_s5 + $0x2e8] sm:$0xff]  ;;  %v499_v51 = vld [vmem:[%s1880_s5 + $0xd8] sm:$0xff] }
  0x12   :  { %229 = vmatprep.subr.mxu0 %v74_v18  ;;  %676 = vmatprep.subr.mxu1 %v503_v44  ;;  %v564_v52 = vld [vmem:[%s1880_s5 + $0x2e0] sm:$0xff]  ;;  %v498_v53 = vld [vmem:[%s1880_s5 + $0xd0] sm:$0xff]  ;;  %v563_v54 = vld [vmem:[%s1880_s5 + $0x2d8] sm:$0xff] }
  0x13   :  { %230 = vmatpush1.msra.mxu0 %v73_v19  ;;  %677 = vmatpush1.msra.mxu1 %v502_v45  ;;  %v497_v55 = vld [vmem:[%s1880_s5 + $0xc8] sm:$0xff]  ;;  %v562_v56 = vld [vmem:[%s1880_s5 + $0x2d0] sm:$0xff]  ;;  %v496_v58 = vld [vmem:[%s1880_s5 + $0xc0] sm:$0xff] }
  0x14   :  { %231 = vmatprep.subr.mxu0 %v68_v20  ;;  %678 = vmatprep.subr.mxu1 %v501_v47  ;;  %v561_v57 = vld [vmem:[%s1880_s5 + $0x2c8] sm:$0xff]  ;;  %v560_v59 = vld [vmem:[%s1880_s5 + $0x2c0] sm:$0xff]  ;;  %v495_v60 = vld [vmem:[%s1880_s5 + $0xb8] sm:$0xff] }
  0x15   :  { %232 = vmatpush1.msra.mxu0 %v67_v21  ;;  %679 = vmatpush1.msra.mxu1 %v500_v49  ;;  %v559_v61 = vld [vmem:[%s1880_s5 + $0x2b8] sm:$0xff]  ;;  %v494_v62 = vld [vmem:[%s1880_s5 + $0xb0] sm:$0xff]  ;;  %v493_v0 = vld [vmem:[%s1880_s5 + $0xa8] sm:$0xff] }
  0x16   :  { %233 = vmatprep.subr.mxu0 %v62_v22  ;;  %680 = vmatprep.subr.mxu1 %v499_v51  ;;  %v558_v63 = vld [vmem:[%s1880_s5 + $0x2b0] sm:$0xff]  ;;  %v557_v1 = vld [vmem:[%s1880_s5 + $0x2a8] sm:$0xff]  ;;  %v492_v2 = vld [vmem:[%s1880_s5 + $0xa0] sm:$0xff] }
  0x17   :  { %234 = vmatpush1.msra.mxu0 %v61_v23  ;;  %681 = vmatpush1.msra.mxu1 %v498_v53  ;;  %v491_v4 = vld [vmem:[%s1880_s5 + $0x98] sm:$0xff]  ;;  %v490_v6 = vld [vmem:[%s1880_s5 + $0x90] sm:$0xff]  ;;  %v489_v8 = vld [vmem:[%s1880_s5 + $0x88] sm:$0xff] }
  0x18   :  { %235 = vmatprep.subr.mxu0 %v56_v24  ;;  %682 = vmatprep.subr.mxu1 %v497_v55  ;;  %v555_v5 = vld [vmem:[%s1880_s5 + $0x298] sm:$0xff]  ;;  %v554_v7 = vld [vmem:[%s1880_s5 + $0x290] sm:$0xff]  ;;  %v553_v9 = vld [vmem:[%s1880_s5 + $0x288] sm:$0xff] }
  0x19   :  { %236 = vmatpush1.msra.mxu0 %v55_v25  ;;  %683 = vmatpush1.msra.mxu1 %v496_v58  ;;  %v488_v10 = vld [vmem:[%s1880_s5 + $0x80] sm:$0xff]  ;;  %v487_v12 = vld [vmem:[%s1880_s5 + $0x78] sm:$0xff]  ;;  %v486_v14 = vld [vmem:[%s1880_s5 + $0x70] sm:$0xff] }
  0x1a   :  { %237 = vmatprep.subr.mxu0 %v50_v26  ;;  %684 = vmatprep.subr.mxu1 %v495_v60  ;;  %v552_v11 = vld [vmem:[%s1880_s5 + $0x280] sm:$0xff]  ;;  %v551_v13 = vld [vmem:[%s1880_s5 + $0x278] sm:$0xff]  ;;  %v485_v16 = vld [vmem:[%s1880_s5 + $0x68] sm:$0xff] }
  0x1b   :  { %238 = vmatpush1.msra.mxu0 %v49_v27  ;;  %685 = vmatpush1.msra.mxu1 %v494_v62  ;;  %v549_v17 = vld [vmem:[%s1880_s5 + $0x268] sm:$0xff]  ;;  %v484_v18 = vld [vmem:[%s1880_s5 + $0x60] sm:$0xff]  ;;  %v483_v20 = vld [vmem:[%s1880_s5 + $0x58] sm:$0xff] }
  0x1c   :  { %239 = vmatprep.subr.mxu0 %v44_v28  ;;  %686 = vmatprep.subr.mxu1 %v493_v0  ;;  %v548_v19 = vld [vmem:[%s1880_s5 + $0x260] sm:$0xff]  ;;  %v547_v21 = vld [vmem:[%s1880_s5 + $0x258] sm:$0xff]  ;;  %v482_v22 = vld [vmem:[%s1880_s5 + $0x50] sm:$0xff] }
  0x1d   :  { %240 = vmatpush1.msra.mxu0 %v43_v29  ;;  %687 = vmatpush1.msra.mxu1 %v492_v2  ;;  %v546_v23 = vld [vmem:[%s1880_s5 + $0x250] sm:$0xff]  ;;  %v481_v24 = vld [vmem:[%s1880_s5 + $0x48] sm:$0xff]  ;;  %v480_v26 = vld [vmem:[%s1880_s5 + $0x40] sm:$0xff] }
  0x1e   :  { %978 = vmatmul.mubr.msk.f32.vlgmr.msra.gmra.mxu0 %vm115_vm1, %v1097_v15  ;;  %979 = vmatprep.subr.msk.mxu0 %vm119_vm0, %v82_v30  ;;  %v545_v25 = vld [vmem:[%s1880_s5 + $0x248] sm:$0xff]  ;;  %v544_v27 = vld [vmem:[%s1880_s5 + $0x240] sm:$0xff]  ;;  %v479_v28 = vld [vmem:[%s1880_s5 + $0x38] sm:$0xff] }
  0x1f   :  { %980 = vmatpush1.msk.msra.mxu0 %vm119_vm0, %v81_v31  ;;  %344 = vmatprep.mubr.f32.mxu0 %v988_v3  ;;  %v556_v3 = vld [vmem:[%s1880_s5 + $0x2a0] sm:$0xff]  ;;  %v543_v29 = vld [vmem:[%s1880_s5 + $0x238] sm:$0xff]  ;;  %v478_v30 = vld [vmem:[%s1880_s5 + $0x30] sm:$0xff] }
  0x20   :  { %300 = vmatprep.subr.mxu0 %v76_v32  ;;  %688 = vmatprep.subr.mxu1 %v491_v4  ;;  %v542_v31 = vld [vmem:[%s1880_s5 + $0x230] sm:$0xff]  ;;  %v477_v32 = vld [vmem:[%s1880_s5 + $0x28] sm:$0xff]  ;;  %v83_v47 = vld [vmem:[%s1881_s2] sm:$0x3f] }
  0x21   :  { %301 = vmatpush1.msra.mxu0 %v75_v33  ;;  %689 = vmatpush1.msra.mxu1 %v490_v6  ;;  %v541_v33 = vld [vmem:[%s1880_s5 + $0x228] sm:$0xff] }
  0x22   :  { %302 = vmatprep.subr.mxu0 %v70_v34  ;;  %690 = vmatprep.subr.mxu1 %v489_v8  ;;  %v476_v34 = vld [vmem:[%s1880_s5 + $0x20] sm:$0xff] }
  0x23   :  { %303 = vmatpush1.msra.mxu0 %v69_v35  ;;  %691 = vmatpush1.msra.mxu1 %v488_v10  ;;  %v540_v35 = vld [vmem:[%s1880_s5 + $0x220] sm:$0xff] }
  0x24   :  { %304 = vmatprep.subr.mxu0 %v64_v36  ;;  %692 = vmatprep.subr.mxu1 %v487_v12  ;;  %v475_v36 = vld [vmem:[%s1880_s5 + $0x18] sm:$0xff] }
  0x25   :  { %305 = vmatpush1.msra.mxu0 %v63_v37  ;;  %693 = vmatpush1.msra.mxu1 %v486_v14  ;;  %v539_v37 = vld [vmem:[%s1880_s5 + $0x218] sm:$0xff] }
  0x26   :  { %306 = vmatprep.subr.mxu0 %v58_v38  ;;  %694 = vmatprep.subr.mxu1 %v485_v16  ;;  %v474_v38 = vld [vmem:[%s1880_s5 + $0x10] sm:$0xff] }
  0x27   :  { %307 = vmatpush1.msra.mxu0 %v57_v39  ;;  %695 = vmatpush1.msra.mxu1 %v484_v18  ;;  %v538_v39 = vld [vmem:[%s1880_s5 + $0x210] sm:$0xff] }
  0x28   :  { %308 = vmatprep.subr.mxu0 %v52_v40  ;;  %696 = vmatprep.subr.mxu1 %v483_v20  ;;  %v473_v40 = vld [vmem:[%s1880_s5 + $0x8] sm:$0xff] }
  0x29   :  { %309 = vmatpush1.msra.mxu0 %v51_v41  ;;  %697 = vmatpush1.msra.mxu1 %v482_v22  ;;  %v537_v41 = vld [vmem:[%s1880_s5 + $0x208] sm:$0xff]  ;;  %v535_v22 = vld [vmem:[%s1880_s5 + $0x1f8] sm:$0xff] }
  0x2a   :  { %310 = vmatprep.subr.mxu0 %v46_v42  ;;  %698 = vmatprep.subr.mxu1 %v481_v24  ;;  %v472_v42 = vld [vmem:[%s1880_s5] sm:$0xff]  ;;  %v534_v24 = vld [vmem:[%s1880_s5 + $0x1f0] sm:$0xff] }
  0x2b   :  { %311 = vmatpush1.msra.mxu0 %v45_v43  ;;  %699 = vmatpush1.msra.mxu1 %v480_v26  ;;  %v85_v43 = vlaneseq  ;;  %v533_v26 = vld [vmem:[%s1880_s5 + $0x1e8] sm:$0xff] }
  0x2c   :  { %981 = vmatmul.mubr.msk.f32.vlgmr.msra.gmra.mxu0 %vm115_vm1, %v1097_v15  ;;  %747 = vmatprep.subr.mxu0 %v567_v46  ;;  %v550_v15 = vld [vmem:[%s1880_s5 + $0x270] sm:$0xff] }
  0x2d   :  { %748 = vmatpush1.msra.mxu0 %v566_v48  ;;  %700 = vmatprep.subr.mxu1 %v479_v28  ;;  %v86_v44 = vshrl.u32 %v85_v43, 7  ;;  %v532_v28 = vld [vmem:[%s1880_s5 + $0x1e0] sm:$0xff]  ;;  %v590_v43 = vld [vmem:[%s1880_s5 + $0x3b0] sm:$0xff] }
  0x2e   :  { %749 = vmatprep.subr.mxu0 %v565_v50  ;;  %701 = vmatpush1.msra.mxu1 %v478_v30  ;;  %v531_v30 = vld [vmem:[%s1880_s5 + $0x1d8] sm:$0xff] }
  0x2f   :  { %750 = vmatpush1.msra.mxu0 %v564_v52  ;;  %702 = vmatprep.subr.mxu1 %v477_v32  ;;  %v1384_v45 = vsub.s32 0, %v86_v44  ;;  %v1386_v46 = vsub.s32 1, %v86_v44  ;;  %v1391_v49 = vsub.s32 2, %v86_v44  ;;  %v530_v32 = vld [vmem:[%s1880_s5 + $0x1d0] sm:$0xff] }
  0x30   :  { %751 = vmatprep.subr.mxu0 %v563_v54  ;;  %703 = vmatpush1.msra.mxu1 %v476_v34  ;;  %v1396_v54 = vsub.s32 3, %v86_v44  ;;  %v529_v34 = vld [vmem:[%s1880_s5 + $0x1c8] sm:$0xff] }
  0x31   :  { %752 = vmatpush1.msra.mxu0 %v562_v56  ;;  %704 = vmatprep.subr.mxu1 %v475_v36  ;;  %v88_v50 = vrot.slane %v83_v47, %v1384_v45  ;;  %v92_v51 = vrot.slane %v83_v47, %v1386_v46  ;;  %v96_v53 = vrot.slane %v83_v47, %v1391_v49  ;;  %v528_v36 = vld [vmem:[%s1880_s5 + $0x1c0] sm:$0xff] }
  0x32   :  { %753 = vmatprep.subr.mxu0 %v561_v57  ;;  %705 = vmatpush1.msra.mxu1 %v474_v38  ;;  %v527_v38 = vld [vmem:[%s1880_s5 + $0x1b8] sm:$0xff] }
  0x33   :  { %754 = vmatpush1.msra.mxu0 %v560_v59  ;;  %706 = vmatprep.subr.mxu1 %v473_v40  ;;  %v100_v59 = vrot.slane %v83_v47, %v1396_v54  ;;  %v526_v40 = vld [vmem:[%s1880_s5 + $0x1b0] sm:$0xff] }
  0x34   :  { %755 = vmatprep.subr.mxu0 %v559_v61  ;;  %707 = vmatpush1.msra.mxu1 %v472_v42  ;;  %v525_v42 = vld [vmem:[%s1880_s5 + $0x1a8] sm:$0xff] }
  0x35   :  { %756 = vmatpush1.msra.mxu0 %v558_v63  ;;  %v1409_v63 = vsub.s32 4, %v86_v44  ;;  %708 = vmatprep.subr.mxu1 %v535_v22  ;;  %v509_v22 = vld [vmem:[%s1880_s5 + $0x128] sm:$0xff] }
  0x36   :  { %757 = vmatprep.subr.mxu0 %v557_v1  ;;  %709 = vmatpush2.msra.mxu1 %v534_v24  ;;  %v508_v24 = vld [vmem:[%s1880_s5 + $0x120] sm:$0xff] }
  0x37   :  { %758 = vmatpush1.msra.mxu0 %v556_v3  ;;  %v1417_v3 = vsub.s32 5, %v86_v44  ;;  %v104_v6 = vrot.slane %v83_v47, %v1409_v63  ;;  %710 = vmatprep.subr.mxu1 %v533_v26  ;;  %v524_v44 = vld [vmem:[%s1880_s5 + $0x1a0] sm:$0xff]  ;;  %v507_v26 = vld [vmem:[%s1880_s5 + $0x118] sm:$0xff] }
  0x38   :  { %759 = vmatprep.subr.mxu0 %v555_v5  ;;  %711 = vmatpush2.msra.mxu1 %v532_v28  ;;  %v506_v28 = vld [vmem:[%s1880_s5 + $0x110] sm:$0xff] }
  0x39   :  { %760 = vmatpush1.msra.mxu0 %v554_v7  ;;  %712 = vmatprep.subr.mxu1 %v531_v30  ;;  %v505_v30 = vld [vmem:[%s1880_s5 + $0x108] sm:$0xff] }
  0x3a   :  { %761 = vmatprep.subr.mxu0 %v553_v9  ;;  %v108_v9 = vrot.slane %v83_v47, %v1417_v3  ;;  %713 = vmatpush2.msra.mxu1 %v530_v32  ;;  %v589_v47 = vld [vmem:[%s1880_s5 + $0x3a8] sm:$0xff]  ;;  %v504_v32 = vld [vmem:[%s1880_s5 + $0x100] sm:$0xff] }
  0x3b   :  { %762 = vmatpush1.msra.mxu0 %v552_v11  ;;  %714 = vmatprep.subr.mxu1 %v529_v34  ;;  %v568_v34 = vld [vmem:[%s1880_s5 + $0x300] sm:$0xff] }
  0x3c   :  { %763 = vmatprep.subr.mxu0 %v551_v13  ;;  %715 = vmatpush2.msra.mxu1 %v528_v36 }
  0x3d   :  { %764 = vmatpush1.msra.mxu0 %v550_v15  ;;  %716 = vmatprep.subr.mxu1 %v527_v38 }
  0x3e   :  { %765 = vmatprep.subr.mxu0 %v549_v17  ;;  %717 = vmatpush2.msra.mxu1 %v526_v40 }
  0x3f   :  { %766 = vmatpush1.msra.mxu0 %v548_v19  ;;  %718 = vmatprep.subr.mxu1 %v525_v42 }
  0x40   :  { %767 = vmatprep.subr.mxu0 %v547_v21  ;;  %719 = vmatpush2.msra.mxu1 %v524_v44  ;;  %v428_v44 = vld [vmem:[%s1883_s4] sm:$0x3f] }
  0x41   :  { %768 = vmatpush1.msra.mxu0 %v546_v23  ;;  %v536_v23 = vld [vmem:[%s1880_s5 + $0x200] sm:$0xff] }
  0x42   :  { %769 = vmatprep.subr.mxu0 %v545_v25  ;;  %v599_v25 = vld [vmem:[%s1880_s5 + $0x3f8] sm:$0xff] }
  0x43   :  { %770 = vmatpush1.msra.mxu0 %v544_v27  ;;  %v598_v27 = vld [vmem:[%s1880_s5 + $0x3f0] sm:$0xff] }
  0x44   :  { %771 = vmatprep.subr.mxu0 %v543_v29  ;;  %v597_v29 = vld [vmem:[%s1880_s5 + $0x3e8] sm:$0xff] }
  0x45   :  { %772 = vmatpush1.msra.mxu0 %v542_v31  ;;  %v596_v31 = vld [vmem:[%s1880_s5 + $0x3e0] sm:$0xff] }
  0x46   :  { %773 = vmatprep.subr.mxu0 %v541_v33  ;;  %v595_v33 = vld [vmem:[%s1880_s5 + $0x3d8] sm:$0xff] }
  0x47   :  { %774 = vmatpush1.msra.mxu0 %v540_v35  ;;  %v594_v35 = vld [vmem:[%s1880_s5 + $0x3d0] sm:$0xff] }
  0x48   :  { %775 = vmatprep.subr.mxu0 %v539_v37  ;;  %v593_v37 = vld [vmem:[%s1880_s5 + $0x3c8] sm:$0xff] }
  0x49   :  { %776 = vmatpush1.msra.mxu0 %v538_v39  ;;  %v592_v39 = vld [vmem:[%s1880_s5 + $0x3c0] sm:$0xff] }
  0x4a   :  { %777 = vmatprep.subr.mxu0 %v537_v41  ;;  %v591_v41 = vld [vmem:[%s1880_s5 + $0x3b8] sm:$0xff] }
  0x4b   :  { %778 = vmatpush1.msra.mxu0 %v536_v23  ;;  %v574_v23 = vld [vmem:[%s1880_s5 + $0x330] sm:$0xff] }
  0x4c   :  { %779 = vmatprep.subr.mxu0 %v599_v25  ;;  %v573_v25 = vld [vmem:[%s1880_s5 + $0x328] sm:$0xff] }
  0x4d   :  { %780 = vmatpush2.msra.mxu0 %v598_v27  ;;  %v572_v27 = vld [vmem:[%s1880_s5 + $0x320] sm:$0xff] }
  0x4e   :  { %781 = vmatprep.subr.mxu0 %v597_v29  ;;  %v571_v29 = vld [vmem:[%s1880_s5 + $0x318] sm:$0xff] }
  0x4f   :  { %782 = vmatpush2.msra.mxu0 %v596_v31  ;;  %v570_v31 = vld [vmem:[%s1880_s5 + $0x310] sm:$0xff] }
  0x50   :  { %783 = vmatprep.subr.mxu0 %v595_v33  ;;  %v569_v33 = vld [vmem:[%s1880_s5 + $0x308] sm:$0xff] }
  0x51   :  { %784 = vmatpush2.msra.mxu0 %v594_v35  ;;  %v631_v35 = vld [vmem:[%s1880_s5 + $0x4f8] sm:$0xff] }
  0x52   :  { %785 = vmatprep.subr.mxu0 %v593_v37 }
  0x53   :  { %786 = vmatpush2.msra.mxu0 %v592_v39 }
  0x54   :  { %787 = vmatprep.subr.mxu0 %v591_v41 }
  0x55   :  { %788 = vmatpush2.msra.mxu0 %v590_v43  ;;  %v390_v43 = vld [vmem:[%s1882_s3] sm:$0x3f] }
  0x56   :  { %789 = vmatprep.subr.mxu0 %v589_v47  ;;  %v403_v47 = vrot.slane %v390_v43, %v1391_v49 }
  0xd0   :  { %v204_v48 = vpop.f32.mrf.mxu0 }
  0xd1   :  { %v1398_v56 = vadd.f32 %v204_v48, %v88_v50  ;;  %v523_v48 = vld [vmem:[%s1880_s5 + $0x198] sm:$0xff]  ;;  %v588_v50 = vld [vmem:[%s1880_s5 + $0x3a0] sm:$0xff] }
  0xd2   :  { %v206_v52 = vpop.f32.mrf.mxu0  ;;  %720 = vmatprep.subr.mxu1 %v523_v48  ;;  %790 = vmatpush2.msra.mxu0 %v588_v50  ;;  %v411_v48 = vrot.slane %v390_v43, %v1409_v63  ;;  %v399_v50 = vrot.slane %v390_v43, %v1386_v46 }
  0xd3   :  { %v1400_v57 = vadd.f32 %v206_v52, %v92_v51  ;;  %v360_v61 = vmul.f32 %v1398_v56, %v1398_v56  ;;  %v522_v51 = vld [vmem:[%s1880_s5 + $0x190] sm:$0xff]  ;;  %v587_v52 = vld [vmem:[%s1880_s5 + $0x398] sm:$0xff] }
  0xd4   :  { %721 = vmatpush2.msra.mxu1 %v522_v51  ;;  %791 = vmatprep.subr.mxu0 %v587_v52  ;;  %v407_v51 = vrot.slane %v390_v43, %v1396_v54  ;;  %v437_v52 = vrot.slane %v428_v44, %v1386_v46 }
  0xd5   :  { %v361_v62 = vmul.f32 %v1400_v57, %v1400_v57  ;;  %v351_v0 = vadd.f32 %v1400_v57, %v1398_v56 }
  0xd7   :  { %v366_v4 = vadd.f32 %v361_v62, %v360_v61  ;;  %v519_v61 = vld [vmem:[%s1880_s5 + $0x178] sm:$0xff]  ;;  %v584_v62 = vld [vmem:[%s1880_s5 + $0x380] sm:$0xff] }
  0xde   :  { %v275_v55 = vpop.f32.mrf.mxu0 }
  0xdf   :  { %v1402_v58 = vadd.f32 %v275_v55, %v96_v53  ;;  %v521_v53 = vld [vmem:[%s1880_s5 + $0x188] sm:$0xff]  ;;  %v586_v55 = vld [vmem:[%s1880_s5 + $0x390] sm:$0xff] }
  0xe0   :  { %v277_v60 = vpop.f32.mrf.mxu0  ;;  %722 = vmatprep.subr.mxu1 %v521_v53  ;;  %792 = vmatpush2.msra.mxu0 %v586_v55  ;;  %v445_v53 = vrot.slane %v428_v44, %v1396_v54  ;;  %v395_v55 = vrot.slane %v390_v43, %v1384_v45 }
  0xe1   :  { %v362_v1 = vmul.f32 %v1402_v58, %v1402_v58  ;;  %v1415_v2 = vadd.f32 %v277_v60, %v100_v59  ;;  %v352_v5 = vadd.f32 %v351_v0, %v1402_v58  ;;  %v520_v59 = vld [vmem:[%s1880_s5 + $0x180] sm:$0xff]  ;;  %v585_v60 = vld [vmem:[%s1880_s5 + $0x388] sm:$0xff]  ;;  %v518_v0 = vld [vmem:[%s1880_s5 + $0x170] sm:$0xff] }
  0xe2   :  { %723 = vmatpush2.msra.mxu1 %v520_v59  ;;  %793 = vmatprep.subr.mxu0 %v585_v60  ;;  %v415_v59 = vrot.slane %v390_v43, %v1417_v3  ;;  %v612_v43 = vld [vmem:[%s1880_s5 + $0x460] sm:$0xff] }
  0xe3   :  { %v367_v7 = vadd.f32 %v366_v4, %v362_v1  ;;  %v363_v8 = vmul.f32 %v1415_v2, %v1415_v2  ;;  %v353_v12 = vadd.f32 %v352_v5, %v1415_v2  ;;  %v583_v1 = vld [vmem:[%s1880_s5 + $0x378] sm:$0xff]  ;;  %v517_v4 = vld [vmem:[%s1880_s5 + $0x168] sm:$0xff]  ;;  %v582_v5 = vld [vmem:[%s1880_s5 + $0x370] sm:$0xff]  ;;  %724 = vmatprep.subr.mxu1 %v519_v61  ;;  %794 = vmatpush2.msra.mxu0 %v584_v62 }
  0xe4   :  { %725 = vmatpush2.msra.mxu1 %v518_v0  ;;  %795 = vmatprep.subr.mxu0 %v583_v1 }
  0xe5   :  { %v368_v17 = vadd.f32 %v367_v7, %v363_v8  ;;  %v581_v7 = vld [vmem:[%s1880_s5 + $0x368] sm:$0xff]  ;;  %v515_v8 = vld [vmem:[%s1880_s5 + $0x158] sm:$0xff]  ;;  %726 = vmatprep.subr.mxu1 %v517_v4  ;;  %796 = vmatpush2.msra.mxu0 %v582_v5  ;;  %v433_v4 = vrot.slane %v428_v44, %v1384_v45  ;;  %v441_v5 = vrot.slane %v428_v44, %v1391_v49 }
  0xe6   :  { %797 = vmatprep.subr.mxu0 %v581_v7 }
  0xec   :  { %v346_v10 = vpop.f32.mrf.mxu0 }
  0xed   :  { %v1424_v11 = vadd.f32 %v346_v10, %v104_v6  ;;  %v516_v6 = vld [vmem:[%s1880_s5 + $0x160] sm:$0xff]  ;;  %v514_v10 = vld [vmem:[%s1880_s5 + $0x150] sm:$0xff] }
  0xee   :  { %v348_v13 = vpop.f32.mrf.mxu0  ;;  %727 = vmatpush2.msra.mxu1 %v516_v6 }
  0xef   :  { %v364_v14 = vmul.f32 %v1424_v11, %v1424_v11  ;;  %v1429_v15 = vadd.f32 %v348_v13, %v108_v9  ;;  %v354_v16 = vadd.f32 %v353_v12, %v1424_v11  ;;  %v580_v9 = vld [vmem:[%s1880_s5 + $0x360] sm:$0xff]  ;;  %v579_v12 = vld [vmem:[%s1880_s5 + $0x358] sm:$0xff]  ;;  %v513_v13 = vld [vmem:[%s1880_s5 + $0x148] sm:$0xff]  ;;  %728 = vmatprep.subr.mxu1 %v515_v8 }
  0xf0   :  { %798 = vmatpush2.msra.mxu0 %v580_v9  ;;  %729 = vmatpush2.msra.mxu1 %v514_v10 }
  0xf1   :  { %v355_v18 = vadd.f32 %v354_v16, %v1429_v15  ;;  %v365_v19 = vmul.f32 %v1429_v15, %v1429_v15  ;;  %v369_v20 = vadd.f32 %v368_v17, %v364_v14  ;;  %v578_v14 = vld [vmem:[%s1880_s5 + $0x350] sm:$0xff]  ;;  %v512_v16 = vld [vmem:[%s1880_s5 + $0x140] sm:$0xff]  ;;  %v577_v17 = vld [vmem:[%s1880_s5 + $0x348] sm:$0xff]  ;;  %799 = vmatprep.subr.mxu0 %v579_v12  ;;  %730 = vmatprep.subr.mxu1 %v513_v13 }
  0xf2   :  { %800 = vmatpush2.msra.mxu0 %v578_v14  ;;  %731 = vmatpush2.msra.mxu1 %v512_v16 }
  0xf3   :  { %356 = vadd.xlane.f32.xlu0 %v355_v18  ;;  %v370_v21 = vadd.f32 %v369_v20, %v365_v19  ;;  %v511_v18 = vld [vmem:[%s1880_s5 + $0x138] sm:$0xff]  ;;  %v576_v19 = vld [vmem:[%s1880_s5 + $0x340] sm:$0xff]  ;;  %v510_v20 = vld [vmem:[%s1880_s5 + $0x130] sm:$0xff]  ;;  %801 = vmatprep.subr.mxu0 %v577_v17 }
  0xf4   :  { %732 = vmatprep.subr.mxu1 %v511_v18  ;;  %802 = vmatpush2.msra.mxu0 %v576_v19 }
  0xf5   :  { %733 = vmatpush2.msra.mxu1 %v510_v20 }
  0xf6   :  { %734 = vmatprep.subr.mxu1 %v509_v22 }
  0xf7   :  { %371 = vadd.xlane.f32.xlu0 %v370_v21  ;;  %v575_v21 = vld [vmem:[%s1880_s5 + $0x338] sm:$0xff]  ;;  %735 = vmatpush2.msra.mxu1 %v508_v24 }
  0xf8   :  { %803 = vmatprep.subr.mxu0 %v575_v21  ;;  %736 = vmatprep.subr.mxu1 %v507_v26 }
  0xf9   :  { %804 = vmatpush2.msra.mxu0 %v574_v23  ;;  %737 = vmatpush2.msra.mxu1 %v506_v28  ;;  %v627_v28 = vld [vmem:[%s1880_s5 + $0x4d8] sm:$0xff] }
  0xfa   :  { %805 = vmatprep.subr.mxu0 %v573_v25  ;;  %738 = vmatprep.subr.mxu1 %v505_v30  ;;  %v629_v25 = vld [vmem:[%s1880_s5 + $0x4e8] sm:$0xff] }
  0xfb   :  { %806 = vmatpush2.msra.mxu0 %v572_v27  ;;  %739 = vmatpush2.msra.mxu1 %v504_v32  ;;  %v628_v27 = vld [vmem:[%s1880_s5 + $0x4e0] sm:$0xff]  ;;  %v625_v30 = vld [vmem:[%s1880_s5 + $0x4c8] sm:$0xff]  ;;  %v623_v32 = vld [vmem:[%s1880_s5 + $0x4b8] sm:$0xff] }
  0xfc   :  { %807 = vmatprep.subr.mxu0 %v571_v29  ;;  %818 = vmatprep.subr.mxu1 %v631_v35  ;;  %v626_v29 = vld [vmem:[%s1880_s5 + $0x4d0] sm:$0xff]  ;;  %v620_v35 = vld [vmem:[%s1880_s5 + $0x4a0] sm:$0xff] }
  0xfd   :  { %808 = vmatpush2.msra.mxu0 %v570_v31  ;;  %v624_v31 = vld [vmem:[%s1880_s5 + $0x4c0] sm:$0xff] }
  0xfe   :  { %809 = vmatprep.subr.mxu0 %v569_v33  ;;  %v622_v33 = vld [vmem:[%s1880_s5 + $0x4b0] sm:$0xff] }
  0xff   :  { %810 = vmatpush2.msra.mxu0 %v568_v34  ;;  %v621_v34 = vld [vmem:[%s1880_s5 + $0x4a8] sm:$0xff] }
 0x17c   :  { %v357_v36 = vpop.xlane.xlu0 %356 }
 0x17d   :  { %v359_v37 = vmul.f32 0.0013020834, %v357_v36  ;;  %v619_v36 = vld [vmem:[%s1880_s5 + $0x498] sm:$0xff] }
 0x17f   :  { %v374_v39 = vmul.f32 %v359_v37, %v359_v37  ;;  %v377_v60 = vsub.f32 %v1400_v57, %v359_v37  ;;  %v379_v61 = vsub.f32 %v1415_v2, %v359_v37  ;;  %v376_v62 = vsub.f32 %v1398_v56, %v359_v37 }
 0x180   :  { %v372_v38 = vpop.xlane.xlu0 %371  ;;  %v378_v0 = vsub.f32 %v1402_v58, %v359_v37  ;;  %v381_v6 = vsub.f32 %v1429_v15, %v359_v37  ;;  %v380_v54 = vsub.f32 %v1424_v11, %v359_v37  ;;  %v453_v2 = vrot.slane %v428_v44, %v1417_v3  ;;  %v618_v37 = vld [vmem:[%s1880_s5 + $0x490] sm:$0xff] }
 0x181   :  { %v373_v40 = vmul.f32 0.0013020834, %v372_v38  ;;  %v449_v56 = vrot.slane %v428_v44, %v1409_v63  ;;  %v630_v63 = vld [vmem:[%s1880_s5 + $0x4f0] sm:$0xff]  ;;  %v617_v38 = vld [vmem:[%s1880_s5 + $0x488] sm:$0xff]  ;;  %v611_v44 = vld [vmem:[%s1880_s5 + $0x458] sm:$0xff] }
 0x183   :  { %v375_v41 = vsub.f32 %v373_v40, %v374_v39  ;;  %v616_v39 = vld [vmem:[%s1880_s5 + $0x480] sm:$0xff]  ;;  %v615_v40 = vld [vmem:[%s1880_s5 + $0x478] sm:$0xff] }
 0x185   :  { %v382_v42 = vadd.f32 1e-05, %v375_v41  ;;  %v614_v41 = vld [vmem:[%s1880_s5 + $0x470] sm:$0xff] }
 0x187   :  { %984 = vrsqrt.f32 %v382_v42  ;;  %v613_v42 = vld [vmem:[%s1880_s5 + $0x468] sm:$0xff] }
 0x194   :  { %v985_v1 = vpop.eup %984 }
 0x195   :  { %v385_v7 = vmul.f32 %v985_v1, %v377_v60  ;;  %v387_v8 = vmul.f32 %v985_v1, %v379_v61  ;;  %v384_v9 = vmul.f32 %v985_v1, %v376_v62  ;;  %v386_v10 = vmul.f32 %v985_v1, %v378_v0  ;;  %v602_v60 = vld [vmem:[%s1880_s5 + $0x410] sm:$0xff]  ;;  %v601_v61 = vld [vmem:[%s1880_s5 + $0x408] sm:$0xff]  ;;  %v600_v62 = vld [vmem:[%s1880_s5 + $0x400] sm:$0xff] }
 0x196   :  { %v389_v57 = vmul.f32 %v985_v1, %v381_v6  ;;  %v388_v12 = vmul.f32 %v985_v1, %v380_v54  ;;  %v663_v0 = vld [vmem:[%s1880_s5 + $0x5f8] sm:$0xff]  ;;  %v662_v1 = vld [vmem:[%s1880_s5 + $0x5f0] sm:$0xff] }
 0x197   :  { %v423_v58 = vmul.f32 %v399_v50, %v385_v7  ;;  %v425_v13 = vmul.f32 %v407_v51, %v387_v8  ;;  %v422_v14 = vmul.f32 %v395_v55, %v384_v9  ;;  %v424_v16 = vmul.f32 %v403_v47, %v386_v10  ;;  %v610_v47 = vld [vmem:[%s1880_s5 + $0x450] sm:$0xff]  ;;  %v608_v50 = vld [vmem:[%s1880_s5 + $0x440] sm:$0xff]  ;;  %v607_v51 = vld [vmem:[%s1880_s5 + $0x438] sm:$0xff] }
 0x198   :  { %v427_v17 = vmul.f32 %v415_v59, %v389_v57  ;;  %v426_v49 = vmul.f32 %v411_v48, %v388_v12  ;;  %v609_v48 = vld [vmem:[%s1880_s5 + $0x448] sm:$0xff]  ;;  %v604_v55 = vld [vmem:[%s1880_s5 + $0x420] sm:$0xff]  ;;  %v603_v59 = vld [vmem:[%s1880_s5 + $0x418] sm:$0xff] }
 0x199   :  { %v461_v18 = vadd.f32 %v437_v52, %v423_v58  ;;  %v463_v15 = vadd.f32 %v445_v53, %v425_v13  ;;  %v460_v19 = vadd.f32 %v433_v4, %v422_v14  ;;  %v462_v11 = vadd.f32 %v441_v5, %v424_v16  ;;  %v606_v52 = vld [vmem:[%s1880_s5 + $0x430] sm:$0xff]  ;;  %v605_v53 = vld [vmem:[%s1880_s5 + $0x428] sm:$0xff]  ;;  %v660_v5 = vld [vmem:[%s1880_s5 + $0x5e0] sm:$0xff] }
 0x19a   :  { %v465_v20 = vadd.f32 %v453_v2, %v427_v17  ;;  %v1657_v21 = vadd.f32 %v449_v56, %v426_v49  ;;  %v661_v4 = vld [vmem:[%s1880_s5 + $0x5e8] sm:$0xff]  ;;  %v659_v6 = vld [vmem:[%s1880_s5 + $0x5d8] sm:$0xff]  ;;  %v658_v54 = vld [vmem:[%s1880_s5 + $0x5d0] sm:$0xff] }
 0x19b   :  { %v467_v22 = vmax.f32 %v461_v18, 0.0  ;;  %v469_v23 = vmax.f32 %v463_v15, 0.0  ;;  %v466_v24 = vmax.f32 %v460_v19, 0.0  ;;  %v468_v3 = vmax.f32 %v462_v11, 0.0  ;;  %v657_v7 = vld [vmem:[%s1880_s5 + $0x5c8] sm:$0xff]  ;;  %v656_v8 = vld [vmem:[%s1880_s5 + $0x5c0] sm:$0xff] }
 0x19c   :  { %v471_v26 = vmax.f32 %v465_v20, 0.0  ;;  %v655_v9 = vld [vmem:[%s1880_s5 + $0x5b8] sm:$0xff]  ;;  %v654_v10 = vld [vmem:[%s1880_s5 + $0x5b0] sm:$0xff]  ;;  %v653_v57 = vld [vmem:[%s1880_s5 + $0x5a8] sm:$0xff] }
 0x19d   :  { %740 = vmatprep.mubr.f32.mxu1 %v467_v22  ;;  %811 = vmatprep.mubr.f32.mxu0 %v469_v23  ;;  %v652_v2 = vld [vmem:[%s1880_s5 + $0x5a0] sm:$0xff]  ;;  %v651_v12 = vld [vmem:[%s1880_s5 + $0x598] sm:$0xff]  ;;  %v650_v56 = vld [vmem:[%s1880_s5 + $0x590] sm:$0xff] }
 0x19e   :  { %741 = vmatmul.mubr.f32.vlgmr.msra.gmra.mxu1 %v466_v24  ;;  %812 = vmatmul.mubr.f32.vlgmr.msra.gmra.mxu0 %v468_v3  ;;  %v649_v58 = vld [vmem:[%s1880_s5 + $0x588] sm:$0xff]  ;;  %v648_v13 = vld [vmem:[%s1880_s5 + $0x580] sm:$0xff]  ;;  %v647_v14 = vld [vmem:[%s1880_s5 + $0x578] sm:$0xff] }
 0x19f   :  { %819 = vmatpush1.msra.mxu1 %v630_v63  ;;  %882 = vmatprep.mubr.f32.mxu1 %v471_v26  ;;  %v646_v16 = vld [vmem:[%s1880_s5 + $0x570] sm:$0xff]  ;;  %v645_v17 = vld [vmem:[%s1880_s5 + $0x568] sm:$0xff]  ;;  %v644_v49 = vld [vmem:[%s1880_s5 + $0x560] sm:$0xff] }
 0x1a0   :  { %820 = vmatprep.subr.mxu1 %v629_v25  ;;  %v643_v18 = vld [vmem:[%s1880_s5 + $0x558] sm:$0xff]  ;;  %v642_v15 = vld [vmem:[%s1880_s5 + $0x550] sm:$0xff]  ;;  %v641_v19 = vld [vmem:[%s1880_s5 + $0x548] sm:$0xff] }
 0x1a1   :  { %821 = vmatpush1.msra.mxu1 %v628_v27  ;;  %v640_v11 = vld [vmem:[%s1880_s5 + $0x540] sm:$0xff]  ;;  %v639_v20 = vld [vmem:[%s1880_s5 + $0x538] sm:$0xff]  ;;  %v638_v22 = vld [vmem:[%s1880_s5 + $0x530] sm:$0xff]  ;;  %v470_v27 = vmax.f32 %v1657_v21, 0.0 }
 0x1a2   :  { %822 = vmatprep.subr.mxu1 %v627_v28  ;;  %v637_v23 = vld [vmem:[%s1880_s5 + $0x528] sm:$0xff]  ;;  %v636_v24 = vld [vmem:[%s1880_s5 + $0x520] sm:$0xff]  ;;  %v635_v3 = vld [vmem:[%s1880_s5 + $0x518] sm:$0xff] }
 0x1a3   :  { %823 = vmatpush1.msra.mxu1 %v626_v29  ;;  %v634_v63 = vld [vmem:[%s1880_s5 + $0x510] sm:$0xff]  ;;  %v633_v25 = vld [vmem:[%s1880_s5 + $0x508] sm:$0xff]  ;;  %v632_v26 = vld [vmem:[%s1880_s5 + $0x500] sm:$0xff] }
 0x1a4   :  { %824 = vmatprep.subr.mxu1 %v625_v30  ;;  %v664_v29 = vld [vmem:[%s1884_s6] sm:$0x3] }
 0x1a5   :  { %825 = vmatpush1.msra.mxu1 %v624_v31  ;;  %v673_v30 = vrot.slane %v664_v29, %v1386_v46  ;;  %v669_v31 = vrot.slane %v664_v29, %v1384_v45 }
 0x1a6   :  { %826 = vmatprep.subr.mxu1 %v623_v32 }
 0x1a7   :  { %827 = vmatpush1.msra.mxu1 %v622_v33 }
 0x1a8   :  { %828 = vmatprep.subr.mxu1 %v621_v34 }
 0x1a9   :  { %829 = vmatpush1.msra.mxu1 %v620_v35 }
 0x1aa   :  { %830 = vmatprep.subr.mxu1 %v619_v36 }
 0x1ab   :  { %831 = vmatpush1.msra.mxu1 %v618_v37 }
 0x1ac   :  { %832 = vmatprep.subr.mxu1 %v617_v38 }
 0x1ad   :  { %833 = vmatpush1.msra.mxu1 %v616_v39 }
 0x1ae   :  { %834 = vmatprep.subr.mxu1 %v615_v40 }
 0x1af   :  { %835 = vmatpush1.msra.mxu1 %v614_v41 }
 0x1b0   :  { %836 = vmatprep.subr.mxu1 %v613_v42 }
 0x1b1   :  { %837 = vmatpush1.msra.mxu1 %v612_v43 }
 0x1b2   :  { %838 = vmatprep.subr.mxu1 %v611_v44 }
 0x1b3   :  { %839 = vmatpush1.msra.mxu1 %v610_v47 }
 0x1b4   :  { %840 = vmatprep.subr.mxu1 %v609_v48 }
 0x1b5   :  { %841 = vmatpush1.msra.mxu1 %v608_v50 }
 0x1b6   :  { %842 = vmatprep.subr.mxu1 %v607_v51  ;;  %v16_v51 = vstv %s1885_s10 }
 0x1b7   :  { %843 = vmatpush1.msra.mxu1 %v606_v52  ;;  %17 = vst [vmem:[#allocation2] sm:$0x1] %v16_v51 }
 0x1b8   :  { %844 = vmatprep.subr.mxu1 %v605_v53 }
 0x1b9   :  { %845 = vmatpush1.msra.mxu1 %v604_v55 }
 0x1ba   :  { %846 = vmatprep.subr.mxu1 %v603_v59 }
 0x1bb   :  { %847 = vmatpush1.msra.mxu1 %v602_v60 }
 0x1bc   :  { %848 = vmatprep.subr.mxu1 %v601_v61 }
 0x1bd   :  { %849 = vmatpush1.msra.mxu1 %v600_v62 }
 0x1be   :  { %850 = vmatprep.subr.mxu1 %v663_v0  ;;  %v911_v0 = vld [vmem:[%s1886_s7] sm:$0x3] }
 0x1bf   :  { %851 = vmatpush2.msra.mxu1 %v662_v1  ;;  %v925_v1 = vld [vmem:[%s1887_s8] sm:$0x3] }
 0x1c0   :  { %852 = vmatprep.subr.mxu1 %v661_v4 }
 0x1c1   :  { %853 = vmatpush2.msra.mxu1 %v660_v5 }
 0x1c2   :  { %854 = vmatprep.subr.mxu1 %v659_v6  ;;  %v916_v6 = vrot.slane %v911_v0, %v1384_v45 }
 0x1c3   :  { %855 = vmatpush2.msra.mxu1 %v658_v54  ;;  %v920_v54 = vrot.slane %v911_v0, %v1386_v46 }
 0x1c4   :  { %856 = vmatprep.subr.mxu1 %v657_v7 }
 0x1c5   :  { %857 = vmatpush2.msra.mxu1 %v656_v8 }
 0x1c6   :  { %858 = vmatprep.subr.mxu1 %v655_v9 }
 0x1c7   :  { %859 = vmatpush2.msra.mxu1 %v654_v10  ;;  %v930_v10 = vrot.slane %v925_v1, %v1384_v45 }
 0x1c8   :  { %860 = vmatprep.subr.mxu1 %v653_v57  ;;  %v934_v57 = vrot.slane %v925_v1, %v1386_v46 }
 0x1c9   :  { %861 = vmatpush2.msra.mxu1 %v652_v2  ;;  %v941_v2 = vld [vmem:[%s1888_s9] sm:$0x3] }
 0x1ca   :  { %862 = vmatprep.subr.mxu1 %v651_v12 }
 0x1cb   :  { %863 = vmatpush2.msra.mxu1 %v650_v56 }
 0x1cc   :  { %864 = vmatprep.subr.mxu1 %v649_v58 }
 0x1cd   :  { %865 = vmatpush2.msra.mxu1 %v648_v13 }
 0x1ce   :  { %866 = vmatprep.subr.mxu1 %v647_v14  ;;  %v946_v14 = vrot.slane %v941_v2, %v1384_v45 }
 0x1cf   :  { %867 = vmatpush2.msra.mxu1 %v646_v16  ;;  %v950_v16 = vrot.slane %v941_v2, %v1386_v46 }
 0x1d0   :  { %868 = vmatprep.subr.mxu1 %v645_v17 }
 0x1d1   :  { %869 = vmatpush2.msra.mxu1 %v644_v49 }
 0x1d2   :  { %870 = vmatprep.subr.mxu1 %v643_v18 }
 0x1d3   :  { %871 = vmatpush2.msra.mxu1 %v642_v15 }
 0x1d4   :  { %872 = vmatprep.subr.mxu1 %v641_v19 }
 0x1d5   :  { %873 = vmatpush2.msra.mxu1 %v640_v11 }
 0x1d6   :  { %874 = vmatprep.subr.mxu1 %v639_v20  ;;  %v982_v20 = vld [vmem:[#allocation2] ss:$0 sm:$0xff] }
 0x1d7   :  { %875 = vmatpush2.msra.mxu1 %v638_v22 }
 0x1d8   :  { %876 = vmatprep.subr.mxu1 %v637_v23 }
 0x1d9   :  { %877 = vmatpush2.msra.mxu1 %v636_v24 }
 0x1da   :  { %878 = vmatprep.subr.mxu1 %v635_v3 }
 0x1db   :  { %879 = vmatpush2.msra.mxu1 %v634_v63 }
 0x1dc   :  { %880 = vmatprep.subr.mxu1 %v633_v25 }
 0x1dd   :  { %881 = vmatpush2.msra.mxu1 %v632_v26 }
 0x1de   :  { %883 = vmatmul.mubr.f32.vlgmr.msra.gmra.mxu1 %v470_v27 }
 0x25e   :  { %v742_v28 = vpop.f32.mrf.mxu1  ;;  %v813_v33 = vpop.f32.mrf.mxu0 }
 0x25f   :  { %v743_v35 = vadd.f32 %v742_v28, %v669_v31 }
 0x260   :  { %v744_v32 = vpop.f32.mrf.mxu1  ;;  %v815_v36 = vpop.f32.mrf.mxu0 }
 0x261   :  { %v745_v34 = vadd.f32 %v744_v32, %v673_v30  ;;  %v814_v39 = vadd.f32 %v813_v33, %v743_v35 }
 0x263   :  { %v816_v38 = vadd.f32 %v815_v36, %v745_v34 }
 0x29e   :  { %v884_v37 = vpop.f32.mrf.mxu1 }
 0x29f   :  { %v885_v41 = vadd.f32 %v884_v37, %v814_v39 }
 0x2a0   :  { %v886_v21 = vpop.f32.mrf.mxu1 }
 0x2a1   :  { %v887_v40 = vadd.f32 %v886_v21, %v816_v38  ;;  %v896_v48 = vmul.f32 %v885_v41, %v885_v41 }
 0x2a3   :  { %v890_v42 = vsel %vm889_vm2, %v887_v40, 0.0  ;;  %v897_v43 = vmul.f32 %v887_v40, %v887_v40 }
 0x2a4   :  { %v891_v44 = vadd.f32 %v890_v42, %v885_v41 }
 0x2a5   :  { %v898_v47 = vsel %vm889_vm2, %v897_v43, 0.0 }
 0x2a6   :  { %892 = vadd.xlane.f32.xlu1 %v891_v44  ;;  %v899_v50 = vadd.f32 %v898_v47, %v896_v48 }
 0x2aa   :  { %900 = vadd.xlane.f32.xlu1 %v899_v50 }
 0x32f   :  { %v893_v52 = vpop.xlane.xlu1 %892 }
 0x330   :  { %v895_v53 = vmul.f32 0.0052083335, %v893_v52 }
 0x332   :  { %v903_v59 = vmul.f32 %v895_v53, %v895_v53  ;;  %v905_v4 = vsub.f32 %v885_v41, %v895_v53  ;;  %v906_v5 = vsub.f32 %v887_v40, %v895_v53 }
 0x333   :  { %v901_v55 = vpop.xlane.xlu1 %900 }
 0x334   :  { %v902_v60 = vmul.f32 0.0052083335, %v901_v55 }
 0x336   :  { %v904_v61 = vsub.f32 %v902_v60, %v903_v59 }
 0x338   :  { %v907_v62 = vadd.f32 1e-05, %v904_v61 }
 0x33a   :  { %986 = vrsqrt.f32 %v907_v62 }
 0x347   :  { %v987_v7 = vpop.eup %986 }
 0x348   :  { %v909_v8 = vmul.f32 %v987_v7, %v905_v4  ;;  %v910_v9 = vmul.f32 %v987_v7, %v906_v5 }
 0x34a   :  { %v923_v12 = vmul.f32 %v916_v6, %v909_v8  ;;  %v924_v56 = vmul.f32 %v920_v54, %v910_v9 }
 0x34c   :  { %v937_v58 = vadd.f32 %v930_v10, %v923_v12  ;;  %v938_v13 = vadd.f32 %v934_v57, %v924_v56 }
 0x34e   :  { %v939_v17 = vmax.f32 %v937_v58, 0.0  ;;  %v940_v49 = vmax.f32 %v938_v13, 0.0 }
 0x350   :  { %v953_v18 = vmul.f32 %v946_v14, %v939_v17  ;;  %v954_v15 = vmul.f32 %v950_v16, %v940_v49 }
 0x352   :  { %v955_v19 = vsel %vm889_vm2, %v954_v15, 0.0 }
 0x353   :  { %v956_v11 = vadd.f32 %v955_v19, %v953_v18 }
 0x355   :  { %957 = vadd.xlane.f32.xlu0 %v956_v11 }
 0x3de   :  { %v958_v22 = vpop.xlane.xlu0 %957 }
 0x3df   :  { %v966_v23 = vadd.f32 %v982_v20, %v958_v22 }
 0x3e1   :  { %968 = vst.msk [vmem:[%s1889_s11] sm:$0xff] %vm967_vm3, %v966_v23 }

</bundles_post_ra>
